<compile_context>
chip_gen: v7x
topology: tpu7x:2x2x1
jax: 0.10.0
libtpu: 0.0.40
codegen_flags: <defaults>
</compile_context>

<pallas_src>
import functools

import jax
import jax.numpy as jnp
from jax.experimental import pallas as pl
from jax.experimental.pallas import tpu as pltpu


# --------------------------------------------------------------------------
# Kernel
# --------------------------------------------------------------------------
def stonet_attention_kernel(xt_ref, xb_ref,
                            wm_ref, bm_ref,
                            wa_ref, ba_ref,
                            ws_ref, bs_ref,
                            wom_ref, woa_ref, wos_ref, bo_ref,
                            out_ref, *, ew_dtype):
    cdt = wm_ref.dtype          # MXU operand dtype (bf16 fast path / f32 strict)
    edt = ew_dtype              # elementwise / tanh dtype (bf16 on v6e/v7x)

    xt = xt_ref[...].astype(edt)
    xb = xb_ref[...].astype(edt)

    # Elementwise combines on the VPU.
    x_mul = (xt * xb).astype(cdt)
    x_add = (xt + xb).astype(cdt)
    x_sub = (xt - xb).astype(cdt)

    def branch(x, w_ref, b_ref):
        # MXU matmul with f32 accumulation, f32 bias add, tanh on the EUP.
        h = jnp.dot(x, w_ref[...], preferred_element_type=jnp.float32) + b_ref[...]
        return jnp.tanh(h.astype(edt))

    ym = branch(x_mul, wm_ref, bm_ref)
    ya = branch(x_add, wa_ref, ba_ref)
    ys = branch(x_sub, ws_ref, bs_ref)

    # Output layer without concat: sum of three matmuls into one f32 accumulator.
    acc = jnp.dot(ym.astype(cdt), wom_ref[...], preferred_element_type=jnp.float32)
    acc = acc + jnp.dot(ya.astype(cdt), woa_ref[...], preferred_element_type=jnp.float32)
    acc = acc + jnp.dot(ys.astype(cdt), wos_ref[...], preferred_element_type=jnp.float32)

    out_ref[...] = jnp.tanh((acc + bo_ref[...]).astype(edt)).astype(out_ref.dtype)


# --------------------------------------------------------------------------
# One-time parameter preparation (hoisted out of the per-call forward)
# --------------------------------------------------------------------------
def _tpu_generation():
    try:
        kind = jax.devices()[0].device_kind.lower()
    except Exception:
        return 0
    for g in (7, 6, 5, 4):
        if f"v{g}" in kind:
            return g
    return 0


def prepare_params(params, *, lane_width=None, compute_dtype=jnp.bfloat16):
    """Split Wo, build block-diagonal (lane-folded) weights, cast dtypes.

    Returns a plan dict consumed by stonet_attention_forward.  Call once and
    reuse; everything here is per-model, not per-batch.
    """
    wm, bm, wa, ba, ws, bs, wo, bo = params
    E = wm.shape[0]
    gen = _tpu_generation()

    if lane_width is None:
        # v6e/v7x have 256x256 MXUs -> pack 256 lanes; v5e (128x128) keeps 128.
        lane_width = 256 if gen >= 6 else 128

    fold = lane_width // E if (E < lane_width and lane_width % E == 0) else 1
    Ef = E * fold

    strict_f32 = jnp.dtype(compute_dtype) == jnp.dtype(jnp.float32)
    # bf16 elementwise/tanh only where the VPU/EUP have a native bf16 datapath.
    ew_dtype = jnp.bfloat16 if (not strict_f32 and gen >= 6) else jnp.float32

    wo_m, wo_a, wo_s = wo[:E], wo[E:2 * E], wo[2 * E:]

    def prep_w(w):
        if fold > 1:
            w = jnp.kron(jnp.eye(fold, dtype=w.dtype), w)   # block-diagonal copies
        return w.astype(compute_dtype)

    def prep_b(b):
        b = b.reshape(1, -1)
        if fold > 1:
            b = jnp.tile(b, (1, fold))
        return b.astype(jnp.float32)                          # bias add stays f32

    weights = (prep_w(wm), prep_b(bm),
               prep_w(wa), prep_b(ba),
               prep_w(ws), prep_b(bs),
               prep_w(wo_m), prep_w(wo_a), prep_w(wo_s), prep_b(bo))
    weights = tuple(jax.device_put(w) for w in weights)

    return dict(E=E, fold=fold, Ef=Ef, gen=gen,
                compute_dtype=compute_dtype, ew_dtype=ew_dtype,
                weights=weights)


# --------------------------------------------------------------------------
# Forward
# --------------------------------------------------------------------------
def stonet_attention_forward(xt, xb, plan, *, batch_tile=2048):
    """xt, xb: (B, E) arrays (the 'e' entry of xs_trunk / xs_branch).

    For the fast path pass bf16 xt/xb (output dtype follows the input dtype);
    for strict parity use prepare_params(..., compute_dtype=jnp.float32) with
    f32 inputs.
    """
    assert batch_tile % 8 == 0, "batch_tile must be a multiple of 8"
    B, E = xt.shape
    assert xb.shape == (B, E)
    assert E == plan["E"]

    fold, Ef, gen = plan["fold"], plan["Ef"], plan["gen"]

    # Pad only to a multiple of the lane fold (needed for the free reshape);
    # ragged grid tiles are handled by Pallas masking -- no tile-size padding.
    Bp = pl.cdiv(B, fold) * fold
    if Bp != B:
        pad = ((0, Bp - B), (0, 0))
        xt = jnp.pad(xt, pad)
        xb = jnp.pad(xb, pad)

    Bf = Bp // fold
    xt_f = xt.reshape(Bf, Ef)      # free row-major reshape (lane packing)
    xb_f = xb.reshape(Bf, Ef)

    # Batch-tile selection.
    if Bf <= batch_tile:
        if gen >= 7 and Bf >= 16:
            # v7x: split into >=2 grid steps so both TensorCores get work.
            bt = ((pl.cdiv(Bf, 2)) + 7) // 8 * 8
        else:
            bt = Bf                # single full-extent block (any size allowed)
    else:
        bt = batch_tile            # multiple of 8; last tile may be ragged
    grid = (pl.cdiv(Bf, bt),)

    act_spec = pl.BlockSpec((bt, Ef), lambda i: (i, 0))
    w_spec = pl.BlockSpec((Ef, Ef), lambda i: (0, 0))    # resident across steps
    b_spec = pl.BlockSpec((1, Ef), lambda i: (0, 0))

    kernel = functools.partial(stonet_attention_kernel, ew_dtype=plan["ew_dtype"])

    out_f = pl.pallas_call(
        kernel,
        out_shape=jax.ShapeDtypeStruct((Bf, Ef), xt.dtype),
        grid_spec=pltpu.PrefetchScalarGridSpec(
            num_scalar_prefetch=0,
            grid=grid,
            in_specs=[
                act_spec, act_spec,
                w_spec, b_spec,          # wm, bm
                w_spec, b_spec,          # wa, ba
                w_spec, b_spec,          # ws, bs
                w_spec, w_spec, w_spec,  # wo_m, wo_a, wo_s
                b_spec,                  # bo
            ],
            out_specs=act_spec,
        ),
        compiler_params=pltpu.CompilerParams(
            dimension_semantics=("parallel",),
            vmem_limit_bytes=48 * 1024 * 1024),
    )(xt_f, xb_f, *plan["weights"])

    out = out_f.reshape(Bp, E)
    return out if Bp == B else out[:B]


# --------------------------------------------------------------------------
# Init + pure-JAX reference
# --------------------------------------------------------------------------
def init_params(key, E):
    """Deterministic init mimicking torch xavier_uniform_ (weights) and
    uniform_(0,1) (biases). Weights stored transposed: (in, out)."""
    ks = jax.random.split(key, 8)

    def xavier(k, fan_in, fan_out):
        limit = (6.0 / (fan_in + fan_out)) ** 0.5
        return jax.random.uniform(k, (fan_in, fan_out), jnp.float32,
                                  minval=-limit, maxval=limit)

    wm = xavier(ks[0], E, E)
    bm = jax.random.uniform(ks[1], (1, E), jnp.float32)
    wa = xavier(ks[2], E, E)
    ba = jax.random.uniform(ks[3], (1, E), jnp.float32)
    ws = xavier(ks[4], E, E)
    bs = jax.random.uniform(ks[5], (1, E), jnp.float32)
    wo = xavier(ks[6], 3 * E, E)
    bo = jax.random.uniform(ks[7], (1, E), jnp.float32)
    return (wm, bm, wa, ba, ws, bs, wo, bo)


def reference_forward(xt, xb, params):
    wm, bm, wa, ba, ws, bs, wo, bo = params
    ym = jnp.tanh((xt * xb) @ wm + bm)
    ya = jnp.tanh((xt + xb) @ wa + ba)
    ysub = jnp.tanh((xt - xb) @ ws + bs)
    cat = jnp.concatenate([ym, ya, ysub], axis=-1)
    return jnp.tanh(cat @ wo + bo)


if __name__ == "__main__":
    key = jax.random.PRNGKey(0)
    B, E = 8, 32  # small shapes: batch=8, embedding_dim e=32

    k_xt, k_xb, k_p = jax.random.split(key, 3)
    xt = jax.random.normal(k_xt, (B, E), jnp.float32)   # xs_trunk['e']
    xb = jax.random.normal(k_xb, (B, E), jnp.float32)   # xs_branch['e']
    params = init_params(k_p, E)

    ref = reference_forward(xt, xb, params)

    # Strict-precision path: f32 inputs, f32 MXU operands, f32 elementwise.
    plan_f32 = prepare_params(params, compute_dtype=jnp.float32)
    out_f32 = jax.block_until_ready(stonet_attention_forward(xt, xb, plan_f32))
    assert out_f32.shape == (B, E)
    assert jnp.allclose(out_f32, ref, atol=1e-4, rtol=1e-4)

    # Fast path: bf16 activation I/O, bf16 MXU operands, f32 accumulation.
    plan_fast = prepare_params(params)                       # bf16 compute dtype
    xt_bf = xt.astype(jnp.bfloat16)
    xb_bf = xb.astype(jnp.bfloat16)
    out_fast = jax.block_until_ready(
        stonet_attention_forward(xt_bf, xb_bf, plan_fast))
    assert out_fast.shape == (B, E)
    assert jnp.allclose(out_fast.astype(jnp.float32), ref, atol=5e-2, rtol=5e-2)

    print("KERNEL_OK")
</pallas_src>

<mosaic_0001>
module attributes {stable_mosaic.version = 11 : i64} {
  func.func @stonet_attention_kernel(%arg0: i32, %arg1: memref<2x128xf32, #tpu.memory_space<vmem>>, %arg2: memref<2x128xf32, #tpu.memory_space<vmem>>, %arg3: memref<128x128xf32, #tpu.memory_space<vmem>>, %arg4: memref<1x128xf32, #tpu.memory_space<vmem>>, %arg5: memref<128x128xf32, #tpu.memory_space<vmem>>, %arg6: memref<1x128xf32, #tpu.memory_space<vmem>>, %arg7: memref<128x128xf32, #tpu.memory_space<vmem>>, %arg8: memref<1x128xf32, #tpu.memory_space<vmem>>, %arg9: memref<128x128xf32, #tpu.memory_space<vmem>>, %arg10: memref<128x128xf32, #tpu.memory_space<vmem>>, %arg11: memref<128x128xf32, #tpu.memory_space<vmem>>, %arg12: memref<1x128xf32, #tpu.memory_space<vmem>>, %arg13: memref<2x128xf32, #tpu.memory_space<vmem>>) attributes {dimension_semantics = [#tpu.dimension_semantics<parallel>], iteration_bounds = array<i64: 1>, scalar_prefetch = 0 : i64, scratch_operands = 0 : i64, tpu.core_type = #tpu.core_type<tc>, window_params = [{transform_indices = @transform_0, window_bounds = array<i64: 2, 128>}, {transform_indices = @transform_1, window_bounds = array<i64: 2, 128>}, {pipeline_mode = #tpu.pipeline_mode<synchronous>, transform_indices = @transform_2, window_bounds = array<i64: 128, 128>}, {pipeline_mode = #tpu.pipeline_mode<synchronous>, transform_indices = @transform_3, window_bounds = array<i64: 1, 128>}, {pipeline_mode = #tpu.pipeline_mode<synchronous>, transform_indices = @transform_4, window_bounds = array<i64: 128, 128>}, {pipeline_mode = #tpu.pipeline_mode<synchronous>, transform_indices = @transform_5, window_bounds = array<i64: 1, 128>}, {pipeline_mode = #tpu.pipeline_mode<synchronous>, transform_indices = @transform_6, window_bounds = array<i64: 128, 128>}, {pipeline_mode = #tpu.pipeline_mode<synchronous>, transform_indices = @transform_7, window_bounds = array<i64: 1, 128>}, {pipeline_mode = #tpu.pipeline_mode<synchronous>, transform_indices = @transform_8, window_bounds = array<i64: 128, 128>}, {pipeline_mode = #tpu.pipeline_mode<synchronous>, transform_indices = @transform_9, window_bounds = array<i64: 128, 128>}, {pipeline_mode = #tpu.pipeline_mode<synchronous>, transform_indices = @transform_10, window_bounds = array<i64: 128, 128>}, {pipeline_mode = #tpu.pipeline_mode<synchronous>, transform_indices = @transform_11, window_bounds = array<i64: 1, 128>}, {transform_indices = @transform_12, window_bounds = array<i64: 2, 128>}]} {
    %c0 = arith.constant 0 : index
    %c0_0 = arith.constant 0 : index
    %0 = vector.load %arg1[%c0, %c0_0] : memref<2x128xf32, #tpu.memory_space<vmem>>, vector<2x128xf32>
    %c0_1 = arith.constant 0 : index
    %c0_2 = arith.constant 0 : index
    %1 = vector.load %arg2[%c0_1, %c0_2] : memref<2x128xf32, #tpu.memory_space<vmem>>, vector<2x128xf32>
    %2 = arith.mulf %0, %1 : vector<2x128xf32>
    %3 = arith.addf %0, %1 : vector<2x128xf32>
    %4 = arith.subf %0, %1 : vector<2x128xf32>
    %c0_3 = arith.constant 0 : index
    %c0_4 = arith.constant 0 : index
    %5 = vector.load %arg3[%c0_3, %c0_4] : memref<128x128xf32, #tpu.memory_space<vmem>>, vector<128x128xf32>
    %cst = arith.constant dense<0.000000e+00> : vector<2x128xf32>
    %6 = tpu.matmul %2, %5, %cst {dimension_numbers = #tpu.dot_dimension_numbers<[1], [0], [0], [1], [0, 0, 1, 1], [], []>} : vector<2x128xf32>, vector<128x128xf32>, vector<2x128xf32> -> vector<2x128xf32>
    %c0_5 = arith.constant 0 : index
    %c0_6 = arith.constant 0 : index
    %7 = vector.load %arg4[%c0_5, %c0_6] : memref<1x128xf32, #tpu.memory_space<vmem>>, vector<1x128xf32>
    %8 = vector.broadcast %7 : vector<1x128xf32> to vector<2x128xf32>
    %9 = arith.addf %6, %8 : vector<2x128xf32>
    %10 = math.tanh %9 : vector<2x128xf32>
    %c0_7 = arith.constant 0 : index
    %c0_8 = arith.constant 0 : index
    %11 = vector.load %arg5[%c0_7, %c0_8] : memref<128x128xf32, #tpu.memory_space<vmem>>, vector<128x128xf32>
    %cst_9 = arith.constant dense<0.000000e+00> : vector<2x128xf32>
    %12 = tpu.matmul %3, %11, %cst_9 {dimension_numbers = #tpu.dot_dimension_numbers<[1], [0], [0], [1], [0, 0, 1, 1], [], []>} : vector<2x128xf32>, vector<128x128xf32>, vector<2x128xf32> -> vector<2x128xf32>
    %c0_10 = arith.constant 0 : index
    %c0_11 = arith.constant 0 : index
    %13 = vector.load %arg6[%c0_10, %c0_11] : memref<1x128xf32, #tpu.memory_space<vmem>>, vector<1x128xf32>
    %14 = vector.broadcast %13 : vector<1x128xf32> to vector<2x128xf32>
    %15 = arith.addf %12, %14 : vector<2x128xf32>
    %16 = math.tanh %15 : vector<2x128xf32>
    %c0_12 = arith.constant 0 : index
    %c0_13 = arith.constant 0 : index
    %17 = vector.load %arg7[%c0_12, %c0_13] : memref<128x128xf32, #tpu.memory_space<vmem>>, vector<128x128xf32>
    %cst_14 = arith.constant dense<0.000000e+00> : vector<2x128xf32>
    %18 = tpu.matmul %4, %17, %cst_14 {dimension_numbers = #tpu.dot_dimension_numbers<[1], [0], [0], [1], [0, 0, 1, 1], [], []>} : vector<2x128xf32>, vector<128x128xf32>, vector<2x128xf32> -> vector<2x128xf32>
    %c0_15 = arith.constant 0 : index
    %c0_16 = arith.constant 0 : index
    %19 = vector.load %arg8[%c0_15, %c0_16] : memref<1x128xf32, #tpu.memory_space<vmem>>, vector<1x128xf32>
    %20 = vector.broadcast %19 : vector<1x128xf32> to vector<2x128xf32>
    %21 = arith.addf %18, %20 : vector<2x128xf32>
    %22 = math.tanh %21 : vector<2x128xf32>
    %c0_17 = arith.constant 0 : index
    %c0_18 = arith.constant 0 : index
    %23 = vector.load %arg9[%c0_17, %c0_18] : memref<128x128xf32, #tpu.memory_space<vmem>>, vector<128x128xf32>
    %cst_19 = arith.constant dense<0.000000e+00> : vector<2x128xf32>
    %24 = tpu.matmul %10, %23, %cst_19 {dimension_numbers = #tpu.dot_dimension_numbers<[1], [0], [0], [1], [0, 0, 1, 1], [], []>} : vector<2x128xf32>, vector<128x128xf32>, vector<2x128xf32> -> vector<2x128xf32>
    %c0_20 = arith.constant 0 : index
    %c0_21 = arith.constant 0 : index
    %25 = vector.load %arg10[%c0_20, %c0_21] : memref<128x128xf32, #tpu.memory_space<vmem>>, vector<128x128xf32>
    %cst_22 = arith.constant dense<0.000000e+00> : vector<2x128xf32>
    %26 = tpu.matmul %16, %25, %cst_22 {dimension_numbers = #tpu.dot_dimension_numbers<[1], [0], [0], [1], [0, 0, 1, 1], [], []>} : vector<2x128xf32>, vector<128x128xf32>, vector<2x128xf32> -> vector<2x128xf32>
    %27 = arith.addf %24, %26 : vector<2x128xf32>
    %c0_23 = arith.constant 0 : index
    %c0_24 = arith.constant 0 : index
    %28 = vector.load %arg11[%c0_23, %c0_24] : memref<128x128xf32, #tpu.memory_space<vmem>>, vector<128x128xf32>
    %cst_25 = arith.constant dense<0.000000e+00> : vector<2x128xf32>
    %29 = tpu.matmul %22, %28, %cst_25 {dimension_numbers = #tpu.dot_dimension_numbers<[1], [0], [0], [1], [0, 0, 1, 1], [], []>} : vector<2x128xf32>, vector<128x128xf32>, vector<2x128xf32> -> vector<2x128xf32>
    %30 = arith.addf %27, %29 : vector<2x128xf32>
    %c0_26 = arith.constant 0 : index
    %c0_27 = arith.constant 0 : index
    %31 = vector.load %arg12[%c0_26, %c0_27] : memref<1x128xf32, #tpu.memory_space<vmem>>, vector<1x128xf32>
    %32 = vector.broadcast %31 : vector<1x128xf32> to vector<2x128xf32>
    %33 = arith.addf %30, %32 : vector<2x128xf32>
    %34 = math.tanh %33 : vector<2x128xf32>
    %c0_28 = arith.constant 0 : index
    %c0_29 = arith.constant 0 : index
    %35 = vector.load %arg13[%c0_28, %c0_29] : memref<2x128xf32, #tpu.memory_space<vmem>>, vector<2x128xf32>
    tpu.vector_store %arg13[%c0_28, %c0_29], %34 {strides = array<i32>} : memref<2x128xf32, #tpu.memory_space<vmem>>, vector<2x128xf32>,
    return
  }
  func.func @transform_0(%arg0: i32) -> (i32, i32) {
    %c0_i32 = arith.constant 0 : i32
    %c0_i32_0 = arith.constant 0 : i32
    return %arg0, %c0_i32 : i32, i32
  }
  func.func @transform_1(%arg0: i32) -> (i32, i32) {
    %c0_i32 = arith.constant 0 : i32
    %c0_i32_0 = arith.constant 0 : i32
    return %arg0, %c0_i32 : i32, i32
  }
  func.func @transform_2(%arg0: i32) -> (i32, i32) {
    %c0_i32 = arith.constant 0 : i32
    %c0_i32_0 = arith.constant 0 : i32
    %c0_i32_1 = arith.constant 0 : i32
    return %c0_i32, %c0_i32_0 : i32, i32
  }
  func.func @transform_3(%arg0: i32) -> (i32, i32) {
    %c0_i32 = arith.constant 0 : i32
    %c0_i32_0 = arith.constant 0 : i32
    %c0_i32_1 = arith.constant 0 : i32
    return %c0_i32, %c0_i32_0 : i32, i32
  }
  func.func @transform_4(%arg0: i32) -> (i32, i32) {
    %c0_i32 = arith.constant 0 : i32
    %c0_i32_0 = arith.constant 0 : i32
    %c0_i32_1 = arith.constant 0 : i32
    return %c0_i32, %c0_i32_0 : i32, i32
  }
  func.func @transform_5(%arg0: i32) -> (i32, i32) {
    %c0_i32 = arith.constant 0 : i32
    %c0_i32_0 = arith.constant 0 : i32
    %c0_i32_1 = arith.constant 0 : i32
    return %c0_i32, %c0_i32_0 : i32, i32
  }
  func.func @transform_6(%arg0: i32) -> (i32, i32) {
    %c0_i32 = arith.constant 0 : i32
    %c0_i32_0 = arith.constant 0 : i32
    %c0_i32_1 = arith.constant 0 : i32
    return %c0_i32, %c0_i32_0 : i32, i32
  }
  func.func @transform_7(%arg0: i32) -> (i32, i32) {
    %c0_i32 = arith.constant 0 : i32
    %c0_i32_0 = arith.constant 0 : i32
    %c0_i32_1 = arith.constant 0 : i32
    return %c0_i32, %c0_i32_0 : i32, i32
  }
  func.func @transform_8(%arg0: i32) -> (i32, i32) {
    %c0_i32 = arith.constant 0 : i32
    %c0_i32_0 = arith.constant 0 : i32
    %c0_i32_1 = arith.constant 0 : i32
    return %c0_i32, %c0_i32_0 : i32, i32
  }
  func.func @transform_9(%arg0: i32) -> (i32, i32) {
    %c0_i32 = arith.constant 0 : i32
    %c0_i32_0 = arith.constant 0 : i32
    %c0_i32_1 = arith.constant 0 : i32
    return %c0_i32, %c0_i32_0 : i32, i32
  }
  func.func @transform_10(%arg0: i32) -> (i32, i32) {
    %c0_i32 = arith.constant 0 : i32
    %c0_i32_0 = arith.constant 0 : i32
    %c0_i32_1 = arith.constant 0 : i32
    return %c0_i32, %c0_i32_0 : i32, i32
  }
  func.func @transform_11(%arg0: i32) -> (i32, i32) {
    %c0_i32 = arith.constant 0 : i32
    %c0_i32_0 = arith.constant 0 : i32
    %c0_i32_1 = arith.constant 0 : i32
    return %c0_i32, %c0_i32_0 : i32, i32
  }
  func.func @transform_12(%arg0: i32) -> (i32, i32) {
    %c0_i32 = arith.constant 0 : i32
    %c0_i32_0 = arith.constant 0 : i32
    return %arg0, %c0_i32 : i32, i32
  }
}

</mosaic_0001>

<bundles_post_ra>
// kernel: tpu_custom_call.1
= control target key start
LH: loop header
LB: loop body
LE: loop exit
PB: predicated region body
PF: predicated region fallthrough
CT: control target
= control target key end

     0   :  { %17 = vsyncpa [#allocation3], 0  ;;  %s1653_s0 = inlined_call_operand.hbm [shape: f32[2,128], index: 0, kind: input, shape index: {}]   ;;  %s1654_s1 = inlined_call_operand.vmem [shape: f32[2,128], index: 1, kind: input, shape index: {}]   ;;  %s1655_s2 = inlined_call_operand.hbm [shape: f32[128,128], index: 2, kind: input, shape index: {}]   ;;  %s1656_s3 = inlined_call_operand.vmem [shape: f32[1,128], index: 3, kind: input, shape index: {}]   ;;  %s1657_s4 = inlined_call_operand.hbm [shape: f32[128,128], index: 4, kind: input, shape index: {}]   ;;  %s1658_s5 = inlined_call_operand.vmem [shape: f32[1,128], index: 5, kind: input, shape index: {}]   ;;  %s1659_s6 = inlined_call_operand.hbm [shape: f32[128,128], index: 6, kind: input, shape index: {}]   ;;  %s1660_s7 = inlined_call_operand.vmem [shape: f32[1,128], index: 7, kind: input, shape index: {}]   ;;  %s1661_s8 = inlined_call_operand.hbm [shape: f32[128,128], index: 8, kind: input, shape index: {}]   ;;  %s1662_s9 = inlined_call_operand.hbm [shape: f32[128,128], index: 9, kind: input, shape index: {}]   ;;  %s1663_s10 = inlined_call_operand.hbm [shape: f32[128,128], index: 10, kind: input, shape index: {}]   ;;  %s1664_s11 = inlined_call_operand.vmem [shape: f32[1,128], index: 11, kind: input, shape index: {}]   ;;  %s1665_s12 = inlined_call_operand.hbm [shape: f32[2,128], index: 12, kind: output, shape index: {}]  }
   0x1   :  { %18 = vsyncpa [#allocation6], 0 }
   0x2   :  { %19 = vsyncpa [#allocation9], 0 }
   0x3   :  { %20 = vsyncpa [#allocation12], 0 }
   0x4   :  { %21 = vsyncpa [#allocation4], 0  ;;  %s1376_s21 = smov [#allocation5]   ;;  %s1190_s25 = scalar_lea.hbm %s1655_s2, 2048 }
   0x5   :  { %s39_s22 = sshll.u32 %s1376_s21, 4  ;;  %p1191_p0 = scmp.ne.s32.totalorder %s1655_s2, %s1190_s25  ;;  %s40_s22 = int_to_ptr.vmem [resolvable:$true] %s39_s22 }
   0x6   :  { %p1194_p1 = scmp.lt.u32.totalorder %s1190_s25, %s1655_s2 }
   0x8   :  { %p1196_p2 = pnand %p1194_p1, %p1191_p0 }
   0xa   :  { %1199 = shalt.err (!%p1196_p2)
}
   0xb   :  { %s1200_s30 = scalar_lea.vmem %s40_s22, 2048  ;;  %p1205_p4 = scmp.lt.s32.totalorder %s40_s22, %s40_s22 }
   0xc   :  { %p1201_p3 = scmp.ne.s32.totalorder %s40_s22, %s1200_s30  ;;  %p1206_p5 = scmp.lt.s32.totalorder %s1200_s30, %s1200_s30 }
   0xe   :  { %p1207_p6 = por %p1206_p5, %p1205_p4 }
  0x10   :  { %p1208_p7 = pnand %p1207_p6, %p1201_p3 }
  0x12   :  { %1211 = shalt.err (!%p1208_p7)
}
  0x13   :  { %s1377_s13 = smov 128   ;;  %s1378_s14 = smov 8  }
  0x14   :  { %45 = dma.hbm_to_vmem [thread:$0]  %s1655_s2, 2048, %s40_s22, [#allocation6], %s1377_s13, %s1377_s13, %s1378_s14  }
  0x15   :  { %s1379_s17 = smov [#allocation8]   ;;  %s1380_s19 = smov [#allocation11]  }
  0x16   :  { %s67_s18 = sshll.u32 %s1379_s17, 4  ;;  %s93_s20 = sshll.u32 %s1380_s19, 4  ;;  %s68_s18 = int_to_ptr.vmem [resolvable:$true] %s67_s18  ;;  %s94_s20 = int_to_ptr.vmem [resolvable:$true] %s93_s20 }
  0x17   :  { %s1212_s24 = scalar_lea.hbm %s1659_s6, 2048 }
  0x18   :  { %p1213_p8 = scmp.ne.s32.totalorder %s1659_s6, %s1212_s24  ;;  %p1216_p9 = scmp.lt.u32.totalorder %s1212_s24, %s1659_s6 }
  0x1a   :  { %p1218_p10 = pnand %p1216_p9, %p1213_p8 }
  0x1c   :  { %1221 = shalt.err (!%p1218_p10)
}
  0x1d   :  { %s1222_s2 = scalar_lea.vmem %s68_s18, 2048  ;;  %p1227_p12 = scmp.lt.s32.totalorder %s68_s18, %s68_s18 }
  0x1e   :  { %p1223_p11 = scmp.ne.s32.totalorder %s68_s18, %s1222_s2  ;;  %p1228_p13 = scmp.lt.s32.totalorder %s1222_s2, %s1222_s2 }
  0x20   :  { %p1229_p0 = por %p1228_p13, %p1227_p12 }
  0x22   :  { %p1230_p1 = pnand %p1229_p0, %p1223_p11 }
  0x24   :  { %1233 = shalt.err (!%p1230_p1)
}
  0x25   :  { %73 = dma.hbm_to_vmem [thread:$0]  %s1659_s6, 2048, %s68_s18, [#allocation9], %s1377_s13, %s1377_s13, %s1378_s14  }
  0x26   :  { %s1234_s16 = scalar_lea.hbm %s1662_s9, 2048 }
  0x27   :  { %p1235_p2 = scmp.ne.s32.totalorder %s1662_s9, %s1234_s16  ;;  %p1238_p3 = scmp.lt.u32.totalorder %s1234_s16, %s1662_s9 }
  0x29   :  { %p1240_p4 = pnand %p1238_p3, %p1235_p2 }
  0x2b   :  { %1243 = shalt.err (!%p1240_p4)
}
  0x2c   :  { %s1244_s24 = scalar_lea.vmem %s94_s20, 2048  ;;  %p1249_p6 = scmp.lt.s32.totalorder %s94_s20, %s94_s20 }
  0x2d   :  { %p1245_p5 = scmp.ne.s32.totalorder %s94_s20, %s1244_s24  ;;  %p1250_p7 = scmp.lt.s32.totalorder %s1244_s24, %s1244_s24 }
  0x2f   :  { %p1251_p8 = por %p1250_p7, %p1249_p6 }
  0x31   :  { %p1252_p9 = pnand %p1251_p8, %p1245_p5 }
  0x33   :  { %1255 = shalt.err (!%p1252_p9)
}
  0x34   :  { %99 = dma.hbm_to_vmem [thread:$0]  %s1662_s9, 2048, %s94_s20, [#allocation12], %s1377_s13, %s1377_s13, %s1378_s14  }
  0x35   :  { %s1381_s25 = smov [#allocation2]   ;;  %s1382_s27 = smov [#allocation7]  }
  0x36   :  { %s28_s26 = sshll.u32 %s1381_s25, 4  ;;  %s53_s28 = sshll.u32 %s1382_s27, 4  ;;  %s29_s26 = int_to_ptr.vmem [resolvable:$true] %s28_s26  ;;  %s54_s28 = int_to_ptr.vmem [resolvable:$true] %s53_s28 }
  0x37   :  { %s1256_s29 = scalar_lea.hbm %s1653_s0, 32 }
  0x38   :  { %p1257_p10 = scmp.ne.s32.totalorder %s1653_s0, %s1256_s29  ;;  %p1260_p11 = scmp.lt.u32.totalorder %s1256_s29, %s1653_s0 }
  0x3a   :  { %p1262_p12 = pnand %p1260_p11, %p1257_p10 }
  0x3c   :  { %1265 = shalt.err (!%p1262_p12)
}
  0x3d   :  { %s1266_s9 = scalar_lea.vmem %s29_s26, 32  ;;  %p1271_p0 = scmp.lt.s32.totalorder %s29_s26, %s29_s26 }
  0x3e   :  { %p1267_p13 = scmp.ne.s32.totalorder %s29_s26, %s1266_s9  ;;  %p1272_p1 = scmp.lt.s32.totalorder %s1266_s9, %s1266_s9 }
  0x40   :  { %p1273_p2 = por %p1272_p1, %p1271_p0 }
  0x42   :  { %p1274_p3 = pnand %p1273_p2, %p1267_p13 }
  0x44   :  { %1277 = shalt.err (!%p1274_p3)
}
  0x45   :  { %31 = dma.hbm_to_vmem [thread:$0]  %s1653_s0, 32, %s29_s26, [#allocation3]  }
  0x46   :  { %s1278_s24 = scalar_lea.hbm %s1657_s4, 2048 }
  0x47   :  { %p1279_p4 = scmp.ne.s32.totalorder %s1657_s4, %s1278_s24  ;;  %p1282_p5 = scmp.lt.u32.totalorder %s1278_s24, %s1657_s4 }
  0x49   :  { %p1284_p6 = pnand %p1282_p5, %p1279_p4 }
  0x4b   :  { %1287 = shalt.err (!%p1284_p6)
}
  0x4c   :  { %s1288_s2 = scalar_lea.vmem %s54_s28, 2048  ;;  %p1293_p8 = scmp.lt.s32.totalorder %s54_s28, %s54_s28 }
  0x4d   :  { %p1289_p7 = scmp.ne.s32.totalorder %s54_s28, %s1288_s2  ;;  %p1294_p9 = scmp.lt.s32.totalorder %s1288_s2, %s1288_s2 }
  0x4f   :  { %p1295_p10 = por %p1294_p9, %p1293_p8 }
  0x51   :  { %p1296_p11 = pnand %p1295_p10, %p1289_p7 }
  0x53   :  { %1299 = shalt.err (!%p1296_p11)
}
  0x54   :  { %59 = dma.hbm_to_vmem [thread:$0]  %s1657_s4, 2048, %s54_s28, [#allocation6], %s1377_s13, %s1377_s13, %s1378_s14  }
  0x55   :  { %s1383_s22 = smov [#allocation10]   ;;  %s1384_s30 = smov [#allocation13]  }
  0x56   :  { %s81_s29 = sshll.u32 %s1383_s22, 4  ;;  %s105_s15 = sshll.u32 %s1384_s30, 4  ;;  %s82_s29 = int_to_ptr.vmem [resolvable:$true] %s81_s29  ;;  %s106_s15 = int_to_ptr.vmem [resolvable:$true] %s105_s15 }
  0x57   :  { %s1300_s9 = scalar_lea.hbm %s1661_s8, 2048 }
  0x58   :  { %p1301_p12 = scmp.ne.s32.totalorder %s1661_s8, %s1300_s9  ;;  %p1304_p13 = scmp.lt.u32.totalorder %s1300_s9, %s1661_s8 }
  0x5a   :  { %p1306_p0 = pnand %p1304_p13, %p1301_p12 }
  0x5c   :  { %1309 = shalt.err (!%p1306_p0)
}
  0x5d   :  { %s1310_s4 = scalar_lea.vmem %s82_s29, 2048  ;;  %p1315_p2 = scmp.lt.s32.totalorder %s82_s29, %s82_s29 }
  0x5e   :  { %p1311_p1 = scmp.ne.s32.totalorder %s82_s29, %s1310_s4  ;;  %p1316_p3 = scmp.lt.s32.totalorder %s1310_s4, %s1310_s4 }
  0x60   :  { %p1317_p4 = por %p1316_p3, %p1315_p2 }
  0x62   :  { %p1318_p5 = pnand %p1317_p4, %p1311_p1 }
  0x64   :  { %1321 = shalt.err (!%p1318_p5)
}
  0x65   :  { %87 = dma.hbm_to_vmem [thread:$0]  %s1661_s8, 2048, %s82_s29, [#allocation9], %s1377_s13, %s1377_s13, %s1378_s14  }
  0x66   :  { %s1322_s25 = scalar_lea.hbm %s1663_s10, 2048 }
  0x67   :  { %p1323_p6 = scmp.ne.s32.totalorder %s1663_s10, %s1322_s25  ;;  %p1326_p7 = scmp.lt.u32.totalorder %s1322_s25, %s1663_s10 }
  0x69   :  { %p1328_p8 = pnand %p1326_p7, %p1323_p6 }
  0x6b   :  { %1331 = shalt.err (!%p1328_p8)
}
  0x6c   :  { %s1332_s22 = scalar_lea.vmem %s106_s15, 2048  ;;  %p1337_p10 = scmp.lt.s32.totalorder %s106_s15, %s106_s15 }
  0x6d   :  { %p1333_p9 = scmp.ne.s32.totalorder %s106_s15, %s1332_s22  ;;  %p1338_p11 = scmp.lt.s32.totalorder %s1332_s22, %s1332_s22 }
  0x6f   :  { %p1339_p12 = por %p1338_p11, %p1337_p10 }
  0x71   :  { %p1340_p13 = pnand %p1339_p12, %p1333_p9 }
  0x73   :  { %1343 = shalt.err (!%p1340_p13)
}
  0x74   :  { %111 = dma.hbm_to_vmem [thread:$0]  %s1663_s10, 2048, %s106_s15, [#allocation12], %s1377_s13, %s1377_s13, %s1378_s14  }
  0x75   :  { %1366 = dma.done.wait [#allocation3], 32  }
  0x76   :  { %1367 = vsyncadd [#allocation3], 4294967264 }
  0x77   :  { %1368 = dma.done.wait [#allocation6], 4096  }
  0x78   :  { %1369 = vsyncadd [#allocation6], 4294963200 }
  0x79   :  { %1370 = dma.done.wait [#allocation9], 4096  }
  0x7a   :  { %1371 = vsyncadd [#allocation9], 4294963200 }
  0x7b   :  { %1372 = dma.done.wait [#allocation12], 4096  }
  0x7c   :  { %1373 = vsyncadd [#allocation12], 4294963200  ;;  %v1385_v0 = vmov 0.0|0.0   ;;  %vm1386_vm0 = vmmov 0   ;;  %v1387_v1 = vmov 0.0   ;;  %v140_v2 = vld [vmem:[#allocation5] sm:$0xff] }
  0x7d   :  { %1025 = vmatprep.subr.bf16.mxu0 %v1385_v0  ;;  %1049 = vmatprep.subr.bf16.mxu1 %v1385_v0  ;;  %v141_v3 = vld [vmem:[#allocation5 + $0x8] sm:$0xff]  ;;  %v234_v4 = vld [vmem:[#allocation7] sm:$0xff]  ;;  %v142_v7 = vld [vmem:[#allocation5 + $0x10] sm:$0xff]  ;;  %s1388_s17 = smov [#allocation14]  }
  0x7e   :  { %847 = vmatprep.mubr.msk.f32.mxu0 %vm1386_vm0, %v1387_v1  ;;  %882 = vmatprep.mubr.msk.f32.mxu1 %vm1386_vm0, %v1387_v1  ;;  %v1026_v5 = vpack.c.bf16 %v141_v3, %v140_v2  ;;  %v235_v6 = vld [vmem:[#allocation7 + $0x8] sm:$0xff]  ;;  %v143_v8 = vld [vmem:[#allocation5 + $0x18] sm:$0xff]  ;;  %v236_v10 = vld [vmem:[#allocation7 + $0x10] sm:$0xff]  ;;  %s697_s9 = sshll.u32 %s1388_s17, 4  ;;  %s698_s9 = int_to_ptr.vmem [resolvable:$true] %s697_s9 }
  0x7f   :  { %v1050_v9 = vpack.c.bf16 %v235_v6, %v234_v4  ;;  %v237_v11 = vld [vmem:[#allocation7 + $0x18] sm:$0xff]  ;;  %v1029_v12 = vpack.c.bf16 %v143_v8, %v142_v7  ;;  %v144_v14 = vld [vmem:[#allocation5 + $0x20] sm:$0xff]  ;;  %v145_v15 = vld [vmem:[#allocation5 + $0x28] sm:$0xff]  ;;  %s1344_s20 = scalar_lea.vmem %s698_s9, 32  ;;  %p1349_p1 = scmp.lt.s32.totalorder %s698_s9, %s698_s9 }
  0x80   :  { %1027 = vmatpush3.bf16.msra.mxu0 %v1026_v5  ;;  %v1053_v13 = vpack.c.bf16 %v237_v11, %v236_v10  ;;  %v238_v16 = vld [vmem:[#allocation7 + $0x20] sm:$0xff]  ;;  %v239_v17 = vld [vmem:[#allocation7 + $0x28] sm:$0xff]  ;;  %v1032_v18 = vpack.c.bf16 %v145_v15, %v144_v14  ;;  %v146_v20 = vld [vmem:[#allocation5 + $0x30] sm:$0xff]  ;;  %p1345_p0 = scmp.ne.s32.totalorder %s698_s9, %s1344_s20  ;;  %p1350_p2 = scmp.lt.s32.totalorder %s1344_s20, %s1344_s20 }
  0x81   :  { %1051 = vmatpush3.bf16.msra.mxu1 %v1050_v9  ;;  %1028 = vmatprep.subr.bf16.mxu0 %v1385_v0  ;;  %v1056_v19 = vpack.c.bf16 %v239_v17, %v238_v16  ;;  %v147_v21 = vld [vmem:[#allocation5 + $0x38] sm:$0xff]  ;;  %v240_v22 = vld [vmem:[#allocation7 + $0x30] sm:$0xff]  ;;  %v148_v26 = vld [vmem:[#allocation5 + $0x40] sm:$0xff] }
  0x82   :  { %1052 = vmatprep.subr.bf16.mxu1 %v1385_v0  ;;  %v241_v23 = vld [vmem:[#allocation7 + $0x38] sm:$0xff]  ;;  %v1035_v24 = vpack.c.bf16 %v147_v21, %v146_v20  ;;  %v149_v27 = vld [vmem:[#allocation5 + $0x48] sm:$0xff]  ;;  %v242_v28 = vld [vmem:[#allocation7 + $0x40] sm:$0xff]  ;;  %p1351_p3 = por %p1350_p2, %p1349_p1 }
  0x83   :  { %v1059_v25 = vpack.c.bf16 %v241_v23, %v240_v22  ;;  %v243_v29 = vld [vmem:[#allocation7 + $0x48] sm:$0xff]  ;;  %v1038_v30 = vpack.c.bf16 %v149_v27, %v148_v26  ;;  %v150_v32 = vld [vmem:[#allocation5 + $0x50] sm:$0xff]  ;;  %v151_v33 = vld [vmem:[#allocation5 + $0x58] sm:$0xff] }
  0x84   :  { %1030 = vmatpush3.bf16.msra.mxu0 %v1029_v12  ;;  %v1062_v31 = vpack.c.bf16 %v243_v29, %v242_v28  ;;  %v244_v34 = vld [vmem:[#allocation7 + $0x50] sm:$0xff]  ;;  %v245_v35 = vld [vmem:[#allocation7 + $0x58] sm:$0xff]  ;;  %v1041_v36 = vpack.c.bf16 %v151_v33, %v150_v32  ;;  %v152_v38 = vld [vmem:[#allocation5 + $0x60] sm:$0xff]  ;;  %p1352_p4 = pnand %p1351_p3, %p1345_p0 }
  0x85   :  { %1054 = vmatpush3.bf16.msra.mxu1 %v1053_v13  ;;  %1031 = vmatprep.subr.bf16.mxu0 %v1385_v0  ;;  %v1065_v37 = vpack.c.bf16 %v245_v35, %v244_v34  ;;  %v153_v39 = vld [vmem:[#allocation5 + $0x68] sm:$0xff]  ;;  %v246_v40 = vld [vmem:[#allocation7 + $0x60] sm:$0xff]  ;;  %v154_v44 = vld [vmem:[#allocation5 + $0x70] sm:$0xff] }
  0x86   :  { %1055 = vmatprep.subr.bf16.mxu1 %v1385_v0  ;;  %v247_v41 = vld [vmem:[#allocation7 + $0x68] sm:$0xff]  ;;  %v1044_v42 = vpack.c.bf16 %v153_v39, %v152_v38  ;;  %v155_v45 = vld [vmem:[#allocation5 + $0x78] sm:$0xff]  ;;  %v248_v46 = vld [vmem:[#allocation7 + $0x70] sm:$0xff] }
  0x87   :  { %v1068_v43 = vpack.c.bf16 %v247_v41, %v246_v40  ;;  %v249_v47 = vld [vmem:[#allocation7 + $0x78] sm:$0xff]  ;;  %v1047_v48 = vpack.c.bf16 %v155_v45, %v154_v44  ;;  %v328_v52 = vld [vmem:[#allocation8] sm:$0xff]  ;;  %v329_v53 = vld [vmem:[#allocation8 + $0x8] sm:$0xff] }
  0x88   :  { %1033 = vmatpush3.bf16.msra.mxu0 %v1032_v18  ;;  %v1574_v49 = vld [vmem:[#allocation2] sm:$0x3]  ;;  %v1071_v51 = vpack.c.bf16 %v249_v47, %v248_v46  ;;  %v438_v55 = vld [vmem:[#allocation11] sm:$0xff]  ;;  %v439_v56 = vld [vmem:[#allocation11 + $0x8] sm:$0xff]  ;;  %v1074_v58 = vpack.c.bf16 %v329_v53, %v328_v52 }
  0x89   :  { %1057 = vmatpush3.bf16.msra.mxu1 %v1056_v19  ;;  %1034 = vmatprep.subr.bf16.mxu0 %v1385_v0  ;;  %v1579_v50 = vld [vmem:[%s1654_s1] sm:$0x3]  ;;  %v330_v59 = vld [vmem:[#allocation8 + $0x10] sm:$0xff]  ;;  %v1098_v61 = vpack.c.bf16 %v439_v56, %v438_v55  ;;  %v332_v3 = vld [vmem:[#allocation8 + $0x20] sm:$0xff] }
  0x8a   :  { %1058 = vmatprep.subr.bf16.mxu1 %v1385_v0  ;;  %v137_v54 = vmul.f32 %v1579_v50, %v1574_v49  ;;  %v138_v57 = vadd.f32 %v1579_v50, %v1574_v49  ;;  %v331_v60 = vld [vmem:[#allocation8 + $0x18] sm:$0xff]  ;;  %v440_v62 = vld [vmem:[#allocation11 + $0x10] sm:$0xff]  ;;  %v333_v4 = vld [vmem:[#allocation8 + $0x28] sm:$0xff]  ;;  %v139_v33 = vsub.f32 %v1574_v49, %v1579_v50 }
  0x8b   :  { %v441_v63 = vld [vmem:[#allocation11 + $0x18] sm:$0xff]  ;;  %v1077_v2 = vpack.c.bf16 %v331_v60, %v330_v59  ;;  %v442_v6 = vld [vmem:[#allocation11 + $0x20] sm:$0xff]  ;;  %v443_v7 = vld [vmem:[#allocation11 + $0x28] sm:$0xff]  ;;  %v1080_v8 = vpack.c.bf16 %v333_v4, %v332_v3 }
  0x8c   :  { %1036 = vmatpush3.bf16.msra.mxu0 %v1035_v24  ;;  %v1101_v5 = vpack.c.bf16 %v441_v63, %v440_v62  ;;  %v334_v9 = vld [vmem:[#allocation8 + $0x30] sm:$0xff]  ;;  %v335_v10 = vld [vmem:[#allocation8 + $0x38] sm:$0xff]  ;;  %v1104_v11 = vpack.c.bf16 %v443_v7, %v442_v6  ;;  %v336_v15 = vld [vmem:[#allocation8 + $0x40] sm:$0xff] }
  0x8d   :  { %1060 = vmatpush3.bf16.msra.mxu1 %v1059_v25  ;;  %1037 = vmatprep.subr.bf16.mxu0 %v1385_v0  ;;  %v444_v12 = vld [vmem:[#allocation11 + $0x30] sm:$0xff]  ;;  %v445_v13 = vld [vmem:[#allocation11 + $0x38] sm:$0xff]  ;;  %v1083_v14 = vpack.c.bf16 %v335_v10, %v334_v9  ;;  %v337_v16 = vld [vmem:[#allocation8 + $0x48] sm:$0xff] }
  0x8e   :  { %1061 = vmatprep.subr.bf16.mxu1 %v1385_v0  ;;  %v1107_v17 = vpack.c.bf16 %v445_v13, %v444_v12  ;;  %v446_v18 = vld [vmem:[#allocation11 + $0x40] sm:$0xff]  ;;  %v447_v19 = vld [vmem:[#allocation11 + $0x48] sm:$0xff]  ;;  %v1086_v20 = vpack.c.bf16 %v337_v16, %v336_v15  ;;  %v338_v21 = vld [vmem:[#allocation8 + $0x50] sm:$0xff] }
  0x8f   :  { %v339_v22 = vld [vmem:[#allocation8 + $0x58] sm:$0xff]  ;;  %v1110_v23 = vpack.c.bf16 %v447_v19, %v446_v18  ;;  %v340_v25 = vld [vmem:[#allocation8 + $0x60] sm:$0xff]  ;;  %v341_v26 = vld [vmem:[#allocation8 + $0x68] sm:$0xff] }
  0x90   :  { %1039 = vmatpush3.bf16.msra.mxu0 %v1038_v30  ;;  %v1089_v24 = vpack.c.bf16 %v339_v22, %v338_v21  ;;  %v1092_v27 = vpack.c.bf16 %v341_v26, %v340_v25  ;;  %v342_v28 = vld [vmem:[#allocation8 + $0x70] sm:$0xff]  ;;  %v343_v29 = vld [vmem:[#allocation8 + $0x78] sm:$0xff]  ;;  %v423_v32 = vld [vmem:[#allocation10 + $0x8] sm:$0xff] }
  0x91   :  { %1063 = vmatpush3.bf16.msra.mxu1 %v1062_v31  ;;  %1040 = vmatprep.subr.bf16.mxu0 %v1385_v0  ;;  %v1095_v30 = vpack.c.bf16 %v343_v29, %v342_v28  ;;  %v422_v31 = vld [vmem:[#allocation10] sm:$0xff]  ;;  %v424_v35 = vld [vmem:[#allocation10 + $0x10] sm:$0xff]  ;;  %v427_v39 = vld [vmem:[#allocation10 + $0x28] sm:$0xff] }
  0x92   :  { %1064 = vmatprep.subr.bf16.mxu1 %v1385_v0  ;;  %v1122_v34 = vpack.c.bf16 %v423_v32, %v422_v31  ;;  %v426_v38 = vld [vmem:[#allocation10 + $0x20] sm:$0xff]  ;;  %v428_v41 = vld [vmem:[#allocation10 + $0x30] sm:$0xff]  ;;  %v431_v45 = vld [vmem:[#allocation10 + $0x48] sm:$0xff] }
  0x93   :  { %v1128_v40 = vpack.c.bf16 %v427_v39, %v426_v38  ;;  %v430_v44 = vld [vmem:[#allocation10 + $0x40] sm:$0xff]  ;;  %v448_v47 = vld [vmem:[#allocation11 + $0x50] sm:$0xff]  ;;  %v453_v59 = vld [vmem:[#allocation11 + $0x78] sm:$0xff] }
  0x94   :  { %1042 = vmatpush3.bf16.msra.mxu0 %v1041_v36  ;;  %v425_v36 = vld [vmem:[#allocation10 + $0x18] sm:$0xff]  ;;  %v1134_v46 = vpack.c.bf16 %v431_v45, %v430_v44  ;;  %v432_v50 = vld [vmem:[#allocation10 + $0x50] sm:$0xff]  ;;  %v450_v53 = vld [vmem:[#allocation11 + $0x60] sm:$0xff] }
  0x95   :  { %1066 = vmatpush3.bf16.msra.mxu1 %v1065_v37  ;;  %1043 = vmatprep.subr.bf16.mxu0 %v1385_v0  ;;  %v1125_v37 = vpack.c.bf16 %v425_v36, %v424_v35  ;;  %v434_v55 = vld [vmem:[#allocation10 + $0x60] sm:$0xff]  ;;  %v437_v62 = vld [vmem:[#allocation10 + $0x78] sm:$0xff]  ;;  %v595_v12 = vld [vmem:[#allocation13 + $0x8] sm:$0xff] }
  0x96   :  { %1067 = vmatprep.subr.bf16.mxu1 %v1385_v0  ;;  %v709_v3 = vld [vmem:[%s1656_s3] ss:$0 sm:$0xff]  ;;  %v596_v15 = vld [vmem:[#allocation13 + $0x10] sm:$0xff]  ;;  %v598_v19 = vld [vmem:[#allocation13 + $0x20] sm:$0xff] }
  0x97   :  { %v710_v4 = vld [vmem:[%s1658_s5] ss:$0 sm:$0xff]  ;;  %v600_v22 = vld [vmem:[#allocation13 + $0x30] sm:$0xff]  ;;  %v602_v25 = vld [vmem:[#allocation13 + $0x40] sm:$0xff] }
  0x98   :  { %1045 = vmatpush3.bf16.msra.mxu0 %v1044_v42  ;;  %v429_v42 = vld [vmem:[#allocation10 + $0x38] sm:$0xff]  ;;  %v603_v26 = vld [vmem:[#allocation13 + $0x48] sm:$0xff] }
  0x99   :  { %1069 = vmatpush3.bf16.msra.mxu1 %v1068_v43  ;;  %1046 = vmatprep.subr.bf16.mxu0 %v1385_v0  ;;  %v1131_v43 = vpack.c.bf16 %v429_v42, %v428_v41  ;;  %v597_v16 = vld [vmem:[#allocation13 + $0x18] sm:$0xff]  ;;  %v607_v35 = vld [vmem:[#allocation13 + $0x68] sm:$0xff] }
  0x9a   :  { %1070 = vmatprep.subr.bf16.mxu1 %v1385_v0  ;;  %v1149_v18 = vpack.c.bf16 %v597_v16, %v596_v15  ;;  %v605_v28 = vld [vmem:[#allocation13 + $0x58] sm:$0xff] }
  0x9b   :  { %v711_v29 = vld [vmem:[%s1660_s7] ss:$0 sm:$0xff] }
  0x9c   :  { %1048 = vmatpush3.bf16.msra.mxu0 %v1047_v48  ;;  %v449_v48 = vld [vmem:[#allocation11 + $0x58] sm:$0xff] }
  0x9d   :  { %1072 = vmatpush3.bf16.msra.mxu1 %v1071_v51  ;;  %1073 = vmatprep.subr.bf16.mxu0 %v1385_v0  ;;  %v1113_v49 = vpack.c.bf16 %v449_v48, %v448_v47  ;;  %v433_v51 = vld [vmem:[#allocation10 + $0x58] sm:$0xff] }
  0x9e   :  { %1097 = vmatprep.subr.bf16.mxu1 %v1385_v0  ;;  %v1137_v52 = vpack.c.bf16 %v433_v51, %v432_v50  ;;  %v609_v38 = vld [vmem:[#allocation13 + $0x78] sm:$0xff] }
  0x9f   :  { %848 = vmatmul.mubr.f32.vlgmr.msra.gmra.mrb[0].mxu0 %v137_v54  ;;  %v451_v54 = vld [vmem:[#allocation11 + $0x68] sm:$0xff]  ;;  %v712_v47 = vld [vmem:[%s1664_s11] ss:$0 sm:$0xff] }
  0xa0   :  { %883 = vmatmul.mubr.f32.vlgmr.msra.gmra.mrb[0].mxu1 %v138_v57  ;;  %1075 = vmatpush3.bf16.msra.mxu0 %v1074_v58  ;;  %v1116_v56 = vpack.c.bf16 %v451_v54, %v450_v53  ;;  %v435_v57 = vld [vmem:[#allocation10 + $0x68] sm:$0xff]  ;;  %v452_v58 = vld [vmem:[#allocation11 + $0x70] sm:$0xff] }
  0xa1   :  { %1076 = vmatprep.subr.bf16.mxu0 %v1385_v0  ;;  %917 = vmatprep.mubr.msk.f32.mxu0 %vm1386_vm0, %v1387_v1  ;;  %v1140_v60 = vpack.c.bf16 %v435_v57, %v434_v55  ;;  %v1119_v63 = vpack.c.bf16 %v453_v59, %v452_v58 }
  0xa2   :  { %1099 = vmatpush3.bf16.msra.mxu1 %v1098_v61  ;;  %952 = vmatprep.mubr.msk.f32.mxu1 %vm1386_vm0, %v1387_v1  ;;  %v436_v61 = vld [vmem:[#allocation10 + $0x70] sm:$0xff] }
  0xa3   :  { %1100 = vmatprep.subr.bf16.mxu1 %v1385_v0 }
  0xa4   :  { %1078 = vmatpush3.bf16.msra.mxu0 %v1077_v2  ;;  %v1143_v2 = vpack.c.bf16 %v437_v62, %v436_v61 }
  0xa5   :  { %1079 = vmatprep.subr.bf16.mxu0 %v1385_v0 }
  0xa6   :  { %1102 = vmatpush3.bf16.msra.mxu1 %v1101_v5 }
  0xa7   :  { %1103 = vmatprep.subr.bf16.mxu1 %v1385_v0 }
  0xa8   :  { %1081 = vmatpush3.bf16.msra.mxu0 %v1080_v8 }
  0xa9   :  { %1082 = vmatprep.subr.bf16.mxu0 %v1385_v0 }
  0xaa   :  { %1105 = vmatpush3.bf16.msra.mxu1 %v1104_v11  ;;  %v594_v11 = vld [vmem:[#allocation13] sm:$0xff] }
  0xab   :  { %1106 = vmatprep.subr.bf16.mxu1 %v1385_v0  ;;  %v1146_v13 = vpack.c.bf16 %v595_v12, %v594_v11 }
  0xac   :  { %1084 = vmatpush3.bf16.msra.mxu0 %v1083_v14 }
  0xad   :  { %1085 = vmatprep.subr.bf16.mxu0 %v1385_v0 }
  0xae   :  { %1108 = vmatpush3.bf16.msra.mxu1 %v1107_v17 }
  0xaf   :  { %1109 = vmatprep.subr.bf16.mxu1 %v1385_v0 }
  0xb0   :  { %1087 = vmatpush3.bf16.msra.mxu0 %v1086_v20  ;;  %v599_v20 = vld [vmem:[#allocation13 + $0x28] sm:$0xff] }
  0xb1   :  { %1088 = vmatprep.subr.bf16.mxu0 %v1385_v0  ;;  %v1152_v21 = vpack.c.bf16 %v599_v20, %v598_v19 }
  0xb2   :  { %1111 = vmatpush3.bf16.msra.mxu1 %v1110_v23  ;;  %v601_v23 = vld [vmem:[#allocation13 + $0x38] sm:$0xff] }
  0xb3   :  { %1112 = vmatprep.subr.bf16.mxu1 %v1385_v0 }
  0xb4   :  { %1090 = vmatpush3.bf16.msra.mxu0 %v1089_v24  ;;  %v1155_v24 = vpack.c.bf16 %v601_v23, %v600_v22 }
  0xb5   :  { %1091 = vmatprep.subr.bf16.mxu0 %v1385_v0 }
  0xb6   :  { %1114 = vmatpush3.bf16.msra.mxu1 %v1113_v49 }
  0xb7   :  { %1115 = vmatprep.subr.bf16.mxu1 %v1385_v0 }
  0xb8   :  { %1093 = vmatpush3.bf16.msra.mxu0 %v1092_v27  ;;  %v1158_v27 = vpack.c.bf16 %v603_v26, %v602_v25 }
  0xb9   :  { %1094 = vmatprep.subr.bf16.mxu0 %v1385_v0 }
  0xba   :  { %1117 = vmatpush3.bf16.msra.mxu1 %v1116_v56 }
  0xbb   :  { %1118 = vmatprep.subr.bf16.mxu1 %v1385_v0 }
  0xbc   :  { %1096 = vmatpush3.bf16.msra.mxu0 %v1095_v30 }
  0xbd   :  { %1121 = vmatprep.subr.bf16.mxu0 %v1385_v0 }
  0xbe   :  { %1120 = vmatpush3.bf16.msra.mxu1 %v1119_v63 }
  0xbf   :  { %918 = vmatmul.mubr.f32.vlgmr.msra.gmra.mrb[2].mxu0 %v139_v33  ;;  %1145 = vmatprep.subr.bf16.mxu1 %v1385_v0 }
  0xc0   :  { %1123 = vmatpush3.bf16.msra.mxu0 %v1122_v34  ;;  %987 = vmatprep.mubr.msk.f32.mxu0 %vm1386_vm0, %v1387_v1  ;;  %v606_v34 = vld [vmem:[#allocation13 + $0x60] sm:$0xff] }
  0xc1   :  { %1124 = vmatprep.subr.bf16.mxu0 %v1385_v0  ;;  %v1164_v36 = vpack.c.bf16 %v607_v35, %v606_v34 }
  0xc4   :  { %1126 = vmatpush3.bf16.msra.mxu0 %v1125_v37  ;;  %v608_v37 = vld [vmem:[#allocation13 + $0x70] sm:$0xff] }
  0xc5   :  { %1127 = vmatprep.subr.bf16.mxu0 %v1385_v0  ;;  %v1167_v39 = vpack.c.bf16 %v609_v38, %v608_v37 }
  0xc8   :  { %1129 = vmatpush3.bf16.msra.mxu0 %v1128_v40 }
  0xc9   :  { %1130 = vmatprep.subr.bf16.mxu0 %v1385_v0 }
  0xcc   :  { %1132 = vmatpush3.bf16.msra.mxu0 %v1131_v43 }
  0xcd   :  { %1133 = vmatprep.subr.bf16.mxu0 %v1385_v0 }
  0xd0   :  { %1135 = vmatpush3.bf16.msra.mxu0 %v1134_v46 }
  0xd1   :  { %1136 = vmatprep.subr.bf16.mxu0 %v1385_v0 }
  0xd4   :  { %1138 = vmatpush3.bf16.msra.mxu0 %v1137_v52 }
  0xd5   :  { %1139 = vmatprep.subr.bf16.mxu0 %v1385_v0 }
  0xd8   :  { %1141 = vmatpush3.bf16.msra.mxu0 %v1140_v60 }
  0xd9   :  { %1142 = vmatprep.subr.bf16.mxu0 %v1385_v0 }
  0xdc   :  { %1144 = vmatpush3.bf16.msra.mxu0 %v1143_v2 }
 0x172   :  { %v229_v5 = vpop.f32.mrb[0].mxu0 }
 0x173   :  { %v230_v6 = vadd.f32 %v709_v3, %v229_v5  ;;  %v323_v7 = vpop.f32.mrb[0].mxu1  ;;  %v849_v8 = vpop.f32.mrb[1].mxu0 }
 0x174   :  { %v324_v9 = vadd.f32 %v710_v4, %v323_v7  ;;  %v884_v10 = vpop.f32.mrb[1].mxu1 }
 0x175   :  { %1182 = vtanh.f32 %v230_v6 }
 0x176   :  { %1184 = vtanh.f32 %v324_v9 }
 0x17f   :  { %v1183_v14 = vpop.eup %1182 }
 0x180   :  { %v1185_v17 = vpop.eup %1184  ;;  %988 = vmatmul.mubr.f32.vlgmr.msra.gmra.mrb[4].mxu0 %v1183_v14 }
 0x181   :  { %953 = vmatmul.mubr.f32.vlgmr.msra.gmra.mrb[2].mxu1 %v1185_v17 }
 0x182   :  { %1147 = vmatpush3.bf16.msra.mxu1 %v1146_v13  ;;  %1022 = vmatprep.mubr.msk.f32.mxu1 %vm1386_vm0, %v1387_v1  ;;  %v604_v1 = vld [vmem:[#allocation13 + $0x50] sm:$0xff] }
 0x183   :  { %1148 = vmatprep.subr.bf16.mxu1 %v1385_v0  ;;  %v1161_v31 = vpack.c.bf16 %v605_v28, %v604_v1 }
 0x186   :  { %1150 = vmatpush3.bf16.msra.mxu1 %v1149_v18 }
 0x187   :  { %1151 = vmatprep.subr.bf16.mxu1 %v1385_v0 }
 0x18a   :  { %1153 = vmatpush3.bf16.msra.mxu1 %v1152_v21 }
 0x18b   :  { %1154 = vmatprep.subr.bf16.mxu1 %v1385_v0 }
 0x18e   :  { %1156 = vmatpush3.bf16.msra.mxu1 %v1155_v24 }
 0x18f   :  { %1157 = vmatprep.subr.bf16.mxu1 %v1385_v0 }
 0x192   :  { %1159 = vmatpush3.bf16.msra.mxu1 %v1158_v27  ;;  %v417_v30 = vpop.f32.mrb[2].mxu0 }
 0x193   :  { %v418_v32 = vadd.f32 %v711_v29, %v417_v30  ;;  %v919_v33 = vpop.f32.mrb[3].mxu0  ;;  %1160 = vmatprep.subr.bf16.mxu1 %v1385_v0 }
 0x195   :  { %1186 = vtanh.f32 %v418_v32 }
 0x196   :  { %1162 = vmatpush3.bf16.msra.mxu1 %v1161_v31 }
 0x197   :  { %1163 = vmatprep.subr.bf16.mxu1 %v1385_v0 }
 0x19a   :  { %1165 = vmatpush3.bf16.msra.mxu1 %v1164_v36 }
 0x19b   :  { %1166 = vmatprep.subr.bf16.mxu1 %v1385_v0 }
 0x19e   :  { %1168 = vmatpush3.bf16.msra.mxu1 %v1167_v39 }
 0x19f   :  { %v1187_v40 = vpop.eup %1186 }
 0x1a1   :  { %1023 = vmatmul.mubr.f32.vlgmr.msra.gmra.mrb[4].mxu1 %v1187_v40 }
 0x253   :  { %v590_v41 = vpop.f32.mrb[4].mxu0 }
 0x254   :  { %v520_v42 = vpop.f32.mrb[2].mxu1  ;;  %v989_v43 = vpop.f32.mrb[5].mxu0 }
 0x255   :  { %v591_v44 = vadd.f32 %v590_v41, %v520_v42  ;;  %v954_v45 = vpop.f32.mrb[3].mxu1 }
 0x274   :  { %v676_v46 = vpop.f32.mrb[4].mxu1 }
 0x275   :  { %v680_v48 = vadd.f32 %v676_v46, %v591_v44  ;;  %v1024_v49 = vpop.f32.mrb[5].mxu1 }
 0x277   :  { %v688_v50 = vadd.f32 %v712_v47, %v680_v48 }
 0x279   :  { %1188 = vtanh.f32 %v688_v50 }
 0x283   :  { %v1189_v0 = vpop.eup %1188 }
 0x284   :  { %690 = vst [vmem:[#allocation14] sm:$0x3] %v1189_v0 }
 0x285   :  { %1355 = shalt.err (!%p1352_p4)
}
 0x286   :  { %s1356_s11 = scalar_lea.hbm %s1665_s12, 32 }
 0x287   :  { %p1357_p5 = scmp.ne.s32.totalorder %s1665_s12, %s1356_s11  ;;  %p1360_p6 = scmp.lt.u32.totalorder %s1356_s11, %s1665_s12 }
 0x289   :  { %p1362_p7 = pnand %p1360_p6, %p1357_p5 }
 0x28b   :  { %1365 = shalt.err (!%p1362_p7)
}
 0x28c   :  { %700 = dma.vmem_to_hbm [thread:$0]  %s698_s9, 32, %s1665_s12, [#allocation4]  }
 0x28d   :  { %1374 = dma.done.wait [#allocation4], 32  }
 0x28e   :  { %1375 = vsyncadd [#allocation4], 4294967264 }
 0x28f   :  { %704 = vsyncpa [#allocation3], 1 }
 0x290   :  { %705 = vsyncpa [#allocation6], 1 }
 0x291   :  { %706 = vsyncpa [#allocation9], 1 }
 0x292   :  { %707 = vsyncpa [#allocation12], 1 }
 0x293   :  { %708 = vsyncpa [#allocation4], 1 }

</bundles_post_ra>
